<compile_context>
chip_gen: v7x
topology: tpu7x:2x2x1
jax: 0.10.0
libtpu: 0.0.40
codegen_flags: <defaults>
</compile_context>

<pallas_src>
import jax
import jax.numpy as jnp
import numpy as np
from jax.experimental import pallas as pl
from jax.experimental.pallas import tpu as pltpu

KH = KW = 3
STRIDE = 2
PAD = 1

IM2COL_MAX_CIN = 128          # fuse the 9 taps into one K=9*C dot at/below this
VMEM_TILE_BUDGET = 24 << 20   # per-tile working-set target (v7x: 64 MiB physical)
VMEM_LIMIT_BYTES = 48 << 20   # explicit scoped-VMEM limit (v5e default is 16 MiB)


def downsample_kernel(y00_ref, y01_ref, y10_ref, y11_ref, y20_ref, y21_ref,
                      w_ref, b_ref, o_ref):
    """One (batch, row-tile) grid step of the stride-2 3x3 conv.

    y{kh}{cp}_ref : (1, TH, Wc, Cin)   tap stream: y[i, j] = x_pad[2i+kh, 2j+cp]
    w_ref         : (KH*KW*Cin, Cout)  bf16 weight, tap-major rows
    b_ref         : (1, Cout)          f32 bias
    o_ref         : (1, TH*Wo, Cout)   f32 output (flat output rows)
    """
    _, th, wc, cin = y00_ref.shape
    _, m, cout = o_ref.shape
    wo = wc - 1

    row_refs = ((y00_ref, y01_ref), (y10_ref, y11_ref), (y20_ref, y21_ref))

    patches = []
    for kh in range(KH):
        for kw in range(KW):
            ref = row_refs[kh][kw % 2]
            co = kw // 2
            # NOTE: co == 1 is a sublane-offset slice; pltpu.roll along the W
            # axis + an aligned [0:wo] slice is an XLU-cheap alternative if the
            # bundle dump shows a relayout copy here.
            patches.append(ref[0, :, co:co + wo, :])          # (TH, Wo, Cin)

    if cin <= IM2COL_MAX_CIN:
        # im2col: one MXU dot with K = 9*Cin (raises K toward systolic depth and
        # cuts vmatmul issue count ~9x when Cin is small).  On v6e/v7x this is
        # profitable up to Cin ~256.
        lhs = jnp.concatenate(patches, axis=-1).reshape(m, KH * KW * cin)
        acc = jnp.dot(lhs, w_ref[...], preferred_element_type=jnp.float32)
    else:
        # Cin already MXU-sized: nine well-shaped K=Cin dots, f32 accumulation.
        acc = jnp.zeros((m, cout), jnp.float32)
        for t, patch in enumerate(patches):
            acc = acc + jnp.dot(patch.reshape(m, cin),
                                w_ref[t * cin:(t + 1) * cin, :],
                                preferred_element_type=jnp.float32)

    acc = acc + b_ref[...]                                     # (1, Cout) broadcast
    o_ref[...] = acc.reshape(1, m, cout).astype(o_ref.dtype)


def _choose_row_tile(ho, wo, wc, cin, cout, in_bytes, out_bytes,
                     budget=VMEM_TILE_BUDGET):
    """Largest divisor of Ho whose double-buffered working set fits the budget."""
    def tile_bytes(th):
        b = 6 * 2 * th * wc * cin * in_bytes             # 6 streams, double-buffered
        b += 2 * th * wo * cout * out_bytes              # output block, double-buffered
        b += KH * KW * cin * cout * in_bytes             # resident weight
        b += th * wo * cout * 4                          # f32 accumulator
        if cin <= IM2COL_MAX_CIN:
            b += th * wo * KH * KW * cin * in_bytes      # im2col lhs value
        return b

    candidates = [th for th in range(1, ho + 1)
                  if ho % th == 0 and (th == ho or (th * wo) % 8 == 0)]
    fitting = [th for th in candidates if tile_bytes(th) <= budget]
    return max(fitting) if fitting else min(candidates)


def downsample(x_nchw, weight_oihw, bias, *, compute_dtype=jnp.bfloat16,
               row_tile=None):
    """Equivalent of DownSample.forward: Conv2d(C, C, 3, stride=2, padding=1)."""
    N, Cin, H, W = x_nchw.shape
    Cout = weight_oihw.shape[0]
    Ho = (H + 2 * PAD - KH) // STRIDE + 1
    Wo = (W + 2 * PAD - KW) // STRIDE + 1
    Wc = Wo + 1                       # col-parity-0 streams carry one halo column

    # ---- layout plumbing (XLA side): cast to bf16 first so every later pass
    # moves half the bytes; pad + strided slices fuse with it.
    # TODO(synk): fold this NCHW -> tap-stream re-layout into the kernel via a
    # pl.ANY input + strided DMA to remove the remaining wrapper HBM pass.
    x = jnp.transpose(x_nchw, (0, 2, 3, 1)).astype(compute_dtype)      # NHWC
    extra_h = max(0, 2 * (Ho - 1) + KH - (H + 2 * PAD))
    extra_w = max(0, 2 * (Wc - 1) + 2 - (W + 2 * PAD))
    xp = jnp.pad(x, ((0, 0), (PAD, PAD + extra_h), (PAD, PAD + extra_w), (0, 0)))

    # Six halo-free tap streams: y[kh][cp][n, i, j, c] = xp[n, 2i+kh, 2j+cp, c]
    streams = [xp[:, kh:kh + 2 * Ho - 1:2, cp:cp + 2 * Wc - 1:2, :]
               for kh in range(KH) for cp in range(2)]

    # Weight: OIHW -> tap-major (KH*KW*Cin, Cout), bf16.  Bias stays f32.
    w2d = jnp.transpose(weight_oihw, (2, 3, 1, 0)).reshape(KH * KW * Cin, Cout)
    w2d = w2d.astype(compute_dtype)
    b2d = bias.astype(jnp.float32).reshape(1, Cout)

    out_dtype = x_nchw.dtype
    in_bytes = np.dtype(compute_dtype).itemsize
    out_bytes = np.dtype(out_dtype).itemsize
    th = row_tile or _choose_row_tile(Ho, Wo, Wc, Cin, Cout, in_bytes, out_bytes)
    assert Ho % th == 0
    grid = (N, Ho // th)

    stream_spec = pl.BlockSpec((1, th, Wc, Cin), lambda n, t: (n, t, 0, 0))
    out_flat = pl.pallas_call(
        downsample_kernel,
        out_shape=jax.ShapeDtypeStruct((N, Ho * Wo, Cout), out_dtype),
        grid=grid,
        in_specs=[stream_spec] * 6 + [
            pl.BlockSpec((KH * KW * Cin, Cout), lambda n, t: (0, 0)),
            pl.BlockSpec((1, Cout), lambda n, t: (0, 0)),
        ],
        out_specs=pl.BlockSpec((1, th * Wo, Cout), lambda n, t: (n, t, 0)),
        compiler_params=pltpu.CompilerParams(
            dimension_semantics=("parallel", "parallel"),
            vmem_limit_bytes=VMEM_LIMIT_BYTES,
        ),
    )(*streams, w2d, b2d)

    out = out_flat.reshape(N, Ho, Wo, Cout)
    return jnp.transpose(out, (0, 3, 1, 2))                   # back to NCHW


if __name__ == "__main__":
    key = jax.random.PRNGKey(0)
    kx, kw_, kb = jax.random.split(key, 3)

    N, C, H, W = 2, 4, 16, 16
    x = jax.random.normal(kx, (N, C, H, W), jnp.float32)

    # Deterministic parameter init (PyTorch Conv2d default U(-1/sqrt(fan_in), +)).
    fan_in = C * KH * KW
    bound = 1.0 / float(np.sqrt(fan_in))
    weight = jax.random.uniform(kw_, (C, C, KH, KW), jnp.float32, -bound, bound)
    bias = jax.random.uniform(kb, (C,), jnp.float32, -bound, bound)

    out = jax.block_until_ready(downsample(x, weight, bias))

    # Reference: XLA conv with the same bf16 quantization of activations and
    # weights that the kernel feeds to the MXU (accumulation is f32 in both).
    xq = x.astype(jnp.bfloat16).astype(jnp.float32)
    wq = weight.astype(jnp.bfloat16).astype(jnp.float32)
    ref = jax.lax.conv_general_dilated(
        xq, wq, window_strides=(STRIDE, STRIDE),
        padding=((PAD, PAD), (PAD, PAD)),
        dimension_numbers=("NCHW", "OIHW", "NCHW"),
        precision=jax.lax.Precision.HIGHEST,
    ) + bias[None, :, None, None]

    np.testing.assert_allclose(np.asarray(out), np.asarray(ref),
                               rtol=1e-4, atol=1e-4)
    print("KERNEL_OK")
</pallas_src>

<mosaic_0001>
module attributes {stable_mosaic.version = 11 : i64} {
  func.func @downsample_kernel(%arg0: i32, %arg1: i32, %arg2: memref<1x8x9x4xbf16, #tpu.memory_space<vmem>>, %arg3: memref<1x8x9x4xbf16, #tpu.memory_space<vmem>>, %arg4: memref<1x8x9x4xbf16, #tpu.memory_space<vmem>>, %arg5: memref<1x8x9x4xbf16, #tpu.memory_space<vmem>>, %arg6: memref<1x8x9x4xbf16, #tpu.memory_space<vmem>>, %arg7: memref<1x8x9x4xbf16, #tpu.memory_space<vmem>>, %arg8: memref<36x4xbf16, #tpu.memory_space<vmem>>, %arg9: memref<1x4xf32, #tpu.memory_space<vmem>>, %arg10: memref<1x64x4xf32, #tpu.memory_space<vmem>>) attributes {dimension_semantics = [#tpu.dimension_semantics<parallel>, #tpu.dimension_semantics<parallel>], iteration_bounds = array<i64: 2, 1>, scalar_prefetch = 0 : i64, scratch_operands = 0 : i64, tpu.core_type = #tpu.core_type<tc>, window_params = [{transform_indices = @transform_0, window_bounds = array<i64: 1, 8, 9, 4>}, {transform_indices = @transform_1, window_bounds = array<i64: 1, 8, 9, 4>}, {transform_indices = @transform_2, window_bounds = array<i64: 1, 8, 9, 4>}, {transform_indices = @transform_3, window_bounds = array<i64: 1, 8, 9, 4>}, {transform_indices = @transform_4, window_bounds = array<i64: 1, 8, 9, 4>}, {transform_indices = @transform_5, window_bounds = array<i64: 1, 8, 9, 4>}, {pipeline_mode = #tpu.pipeline_mode<synchronous>, transform_indices = @transform_6, window_bounds = array<i64: 36, 4>}, {pipeline_mode = #tpu.pipeline_mode<synchronous>, transform_indices = @transform_7, window_bounds = array<i64: 1, 4>}, {transform_indices = @transform_8, window_bounds = array<i64: 1, 64, 4>}]} {
    %c0 = arith.constant 0 : index
    %c0_0 = arith.constant 0 : index
    %c0_1 = arith.constant 0 : index
    %c0_2 = arith.constant 0 : index
    %0 = vector.load %arg2[%c0, %c0_0, %c0_1, %c0_2] : memref<1x8x9x4xbf16, #tpu.memory_space<vmem>>, vector<1x8x8x4xbf16>
    %1 = vector.shape_cast %0 : vector<1x8x8x4xbf16> to vector<8x8x4xbf16>
    %c0_3 = arith.constant 0 : index
    %c0_4 = arith.constant 0 : index
    %c0_5 = arith.constant 0 : index
    %c0_6 = arith.constant 0 : index
    %2 = vector.load %arg3[%c0_3, %c0_4, %c0_5, %c0_6] : memref<1x8x9x4xbf16, #tpu.memory_space<vmem>>, vector<1x8x8x4xbf16>
    %3 = vector.shape_cast %2 : vector<1x8x8x4xbf16> to vector<8x8x4xbf16>
    %c0_7 = arith.constant 0 : index
    %c0_8 = arith.constant 0 : index
    %c1 = arith.constant 1 : index
    %c0_9 = arith.constant 0 : index
    %4 = vector.load %arg2[%c0_7, %c0_8, %c1, %c0_9] : memref<1x8x9x4xbf16, #tpu.memory_space<vmem>>, vector<1x8x8x4xbf16>
    %5 = vector.shape_cast %4 : vector<1x8x8x4xbf16> to vector<8x8x4xbf16>
    %c0_10 = arith.constant 0 : index
    %c0_11 = arith.constant 0 : index
    %c0_12 = arith.constant 0 : index
    %c0_13 = arith.constant 0 : index
    %6 = vector.load %arg4[%c0_10, %c0_11, %c0_12, %c0_13] : memref<1x8x9x4xbf16, #tpu.memory_space<vmem>>, vector<1x8x8x4xbf16>
    %7 = vector.shape_cast %6 : vector<1x8x8x4xbf16> to vector<8x8x4xbf16>
    %c0_14 = arith.constant 0 : index
    %c0_15 = arith.constant 0 : index
    %c0_16 = arith.constant 0 : index
    %c0_17 = arith.constant 0 : index
    %8 = vector.load %arg5[%c0_14, %c0_15, %c0_16, %c0_17] : memref<1x8x9x4xbf16, #tpu.memory_space<vmem>>, vector<1x8x8x4xbf16>
    %9 = vector.shape_cast %8 : vector<1x8x8x4xbf16> to vector<8x8x4xbf16>
    %c0_18 = arith.constant 0 : index
    %c0_19 = arith.constant 0 : index
    %c1_20 = arith.constant 1 : index
    %c0_21 = arith.constant 0 : index
    %10 = vector.load %arg4[%c0_18, %c0_19, %c1_20, %c0_21] : memref<1x8x9x4xbf16, #tpu.memory_space<vmem>>, vector<1x8x8x4xbf16>
    %11 = vector.shape_cast %10 : vector<1x8x8x4xbf16> to vector<8x8x4xbf16>
    %c0_22 = arith.constant 0 : index
    %c0_23 = arith.constant 0 : index
    %c0_24 = arith.constant 0 : index
    %c0_25 = arith.constant 0 : index
    %12 = vector.load %arg6[%c0_22, %c0_23, %c0_24, %c0_25] : memref<1x8x9x4xbf16, #tpu.memory_space<vmem>>, vector<1x8x8x4xbf16>
    %13 = vector.shape_cast %12 : vector<1x8x8x4xbf16> to vector<8x8x4xbf16>
    %c0_26 = arith.constant 0 : index
    %c0_27 = arith.constant 0 : index
    %c0_28 = arith.constant 0 : index
    %c0_29 = arith.constant 0 : index
    %14 = vector.load %arg7[%c0_26, %c0_27, %c0_28, %c0_29] : memref<1x8x9x4xbf16, #tpu.memory_space<vmem>>, vector<1x8x8x4xbf16>
    %15 = vector.shape_cast %14 : vector<1x8x8x4xbf16> to vector<8x8x4xbf16>
    %c0_30 = arith.constant 0 : index
    %c0_31 = arith.constant 0 : index
    %c1_32 = arith.constant 1 : index
    %c0_33 = arith.constant 0 : index
    %16 = vector.load %arg6[%c0_30, %c0_31, %c1_32, %c0_33] : memref<1x8x9x4xbf16, #tpu.memory_space<vmem>>, vector<1x8x8x4xbf16>
    %17 = vector.shape_cast %16 : vector<1x8x8x4xbf16> to vector<8x8x4xbf16>
    %18 = tpu.concatenate %1, %3, %5, %7, %9, %11, %13, %15, %17 in 2 : vector<8x8x4xbf16>, vector<8x8x4xbf16>, vector<8x8x4xbf16>, vector<8x8x4xbf16>, vector<8x8x4xbf16>, vector<8x8x4xbf16>, vector<8x8x4xbf16>, vector<8x8x4xbf16>, vector<8x8x4xbf16> -> vector<8x8x36xbf16>
    %19 = vector.shape_cast %18 : vector<8x8x36xbf16> to vector<64x36xbf16>
    %c0_34 = arith.constant 0 : index
    %c0_35 = arith.constant 0 : index
    %20 = vector.load %arg8[%c0_34, %c0_35] : memref<36x4xbf16, #tpu.memory_space<vmem>>, vector<36x4xbf16>
    %cst = arith.constant dense<0.000000e+00> : vector<64x4xf32>
    %21 = tpu.matmul %19, %20, %cst {dimension_numbers = #tpu.dot_dimension_numbers<[1], [0], [0], [1], [0, 0, 1, 1], [], []>} : vector<64x36xbf16>, vector<36x4xbf16>, vector<64x4xf32> -> vector<64x4xf32>
    %c0_36 = arith.constant 0 : index
    %c0_37 = arith.constant 0 : index
    %22 = vector.load %arg9[%c0_36, %c0_37] : memref<1x4xf32, #tpu.memory_space<vmem>>, vector<1x4xf32>
    %23 = vector.broadcast %22 : vector<1x4xf32> to vector<64x4xf32>
    %24 = arith.addf %21, %23 : vector<64x4xf32>
    %25 = vector.shape_cast %24 : vector<64x4xf32> to vector<1x64x4xf32>
    %c0_38 = arith.constant 0 : index
    %c0_39 = arith.constant 0 : index
    %c0_40 = arith.constant 0 : index
    %26 = vector.load %arg10[%c0_38, %c0_39, %c0_40] : memref<1x64x4xf32, #tpu.memory_space<vmem>>, vector<1x64x4xf32>
    tpu.vector_store %arg10[%c0_38, %c0_39, %c0_40], %25 {strides = array<i32>} : memref<1x64x4xf32, #tpu.memory_space<vmem>>, vector<1x64x4xf32>,
    return
  }
  func.func @transform_0(%arg0: i32, %arg1: i32) -> (i32, i32, i32, i32) {
    %c0_i32 = arith.constant 0 : i32
    %c0_i32_0 = arith.constant 0 : i32
    %c0_i32_1 = arith.constant 0 : i32
    return %arg0, %arg1, %c0_i32, %c0_i32_0 : i32, i32, i32, i32
  }
  func.func @transform_1(%arg0: i32, %arg1: i32) -> (i32, i32, i32, i32) {
    %c0_i32 = arith.constant 0 : i32
    %c0_i32_0 = arith.constant 0 : i32
    %c0_i32_1 = arith.constant 0 : i32
    return %arg0, %arg1, %c0_i32, %c0_i32_0 : i32, i32, i32, i32
  }
  func.func @transform_2(%arg0: i32, %arg1: i32) -> (i32, i32, i32, i32) {
    %c0_i32 = arith.constant 0 : i32
    %c0_i32_0 = arith.constant 0 : i32
    %c0_i32_1 = arith.constant 0 : i32
    return %arg0, %arg1, %c0_i32, %c0_i32_0 : i32, i32, i32, i32
  }
  func.func @transform_3(%arg0: i32, %arg1: i32) -> (i32, i32, i32, i32) {
    %c0_i32 = arith.constant 0 : i32
    %c0_i32_0 = arith.constant 0 : i32
    %c0_i32_1 = arith.constant 0 : i32
    return %arg0, %arg1, %c0_i32, %c0_i32_0 : i32, i32, i32, i32
  }
  func.func @transform_4(%arg0: i32, %arg1: i32) -> (i32, i32, i32, i32) {
    %c0_i32 = arith.constant 0 : i32
    %c0_i32_0 = arith.constant 0 : i32
    %c0_i32_1 = arith.constant 0 : i32
    return %arg0, %arg1, %c0_i32, %c0_i32_0 : i32, i32, i32, i32
  }
  func.func @transform_5(%arg0: i32, %arg1: i32) -> (i32, i32, i32, i32) {
    %c0_i32 = arith.constant 0 : i32
    %c0_i32_0 = arith.constant 0 : i32
    %c0_i32_1 = arith.constant 0 : i32
    return %arg0, %arg1, %c0_i32, %c0_i32_0 : i32, i32, i32, i32
  }
  func.func @transform_6(%arg0: i32, %arg1: i32) -> (i32, i32) {
    %c0_i32 = arith.constant 0 : i32
    %c0_i32_0 = arith.constant 0 : i32
    %c0_i32_1 = arith.constant 0 : i32
    return %c0_i32, %c0_i32_0 : i32, i32
  }
  func.func @transform_7(%arg0: i32, %arg1: i32) -> (i32, i32) {
    %c0_i32 = arith.constant 0 : i32
    %c0_i32_0 = arith.constant 0 : i32
    %c0_i32_1 = arith.constant 0 : i32
    return %c0_i32, %c0_i32_0 : i32, i32
  }
  func.func @transform_8(%arg0: i32, %arg1: i32) -> (i32, i32, i32) {
    %c0_i32 = arith.constant 0 : i32
    %c0_i32_0 = arith.constant 0 : i32
    return %arg0, %arg1, %c0_i32 : i32, i32, i32
  }
}

</mosaic_0001>

<bundles_post_ra>
// kernel: tpu_custom_call.1
= control target key start
LH: loop header
LB: loop body
LE: loop exit
PB: predicated region body
PF: predicated region fallthrough
CT: control target
= control target key end

     0   :  { %s1905_s27 = smov 0   ;;  %s1907_s28 = smov 0   ;;  %s2214_s0 = inlined_call_operand.vmem [shape: bf16[2,8,9,4], index: 0, kind: input, shape index: {}]   ;;  %s2215_s1 = inlined_call_operand.vmem [shape: bf16[2,8,9,4], index: 1, kind: input, shape index: {}]   ;;  %s2216_s2 = inlined_call_operand.vmem [shape: bf16[2,8,9,4], index: 2, kind: input, shape index: {}]   ;;  %s2217_s3 = inlined_call_operand.vmem [shape: bf16[2,8,9,4], index: 3, kind: input, shape index: {}]   ;;  %s2218_s4 = inlined_call_operand.vmem [shape: bf16[2,8,9,4], index: 4, kind: input, shape index: {}]   ;;  %s2219_s5 = inlined_call_operand.vmem [shape: bf16[2,8,9,4], index: 5, kind: input, shape index: {}]   ;;  %s2220_s6 = inlined_call_operand.vmem [shape: bf16[36,4], index: 6, kind: input, shape index: {}]   ;;  %s2221_s7 = inlined_call_operand.vmem [shape: f32[1,4], index: 7, kind: input, shape index: {}]   ;;  %s2222_s8 = inlined_call_operand.vmem [shape: f32[2,64,4], index: 8, kind: output, shape index: {}]  }
   0x1   :  { %s1909_s29 = smov 0  }
   0x2 LB: > { %s30_s30 = sadd.s32 1, %s1846_s28  ;;  %p1600_p0 = scmp.ge.s32.totalorder %s1850_s29, 1  ;;  %s1850_s29 = sphi %s1909_s29, %s18_s29   ;;  %s1846_s28 = sphi %s1907_s28, %s2224_s28   ;;  %s1842_s27 = sphi %s1905_s27, %s2223_s27  }
   0x3   : > { %p32_p1 = scmp.ge.s32.totalorder %s30_s30, 2  ;;  %p374_p2 = scmp.lt.s32.totalorder %s1850_s29, 3 }
   0x5   : > { %s2226_s30 = smov (%p32_p1, %s30_s30), 0  ;;  %p375_p3 = pnand %p1600_p0, %p374_p2 }
   0x6   : > { %p468_p4 = scmp.lt.s32.totalorder (!%p375_p3), %s1842_s27, 1  ;;  %s1852_s13 = smov (!%p375_p3), 4   ;;  %vm1324_vm0 = vcmask (!%p375_p3), 1041408   ;;  %vm1120_vm1 = vcmask (!%p375_p3), 31744   ;;  %vm1145_vm2 = vcmask (!%p375_p3), 64512   ;;  %vm1162_vm3 = vcmask (!%p375_p3), 97280  }
   0x7   : > { %378 = sbr.rel (%p375_p3) target bundleno = 479 (0x1df), region = 52  ;;  %s1853_s17 = smov (!%p375_p3), 8   ;;  %vm1179_vm4 = vcmask (!%p375_p3), 130048   ;;  %vm1196_vm5 = vcmask (!%p375_p3), 162816   ;;  %vm1213_vm6 = vcmask (!%p375_p3), 195584   ;;  %vm1230_vm7 = vcmask (!%p375_p3), 228352  }
   0x8   : > { %s1854_s24 = smov (!%p375_p3), 12   ;;  %s1855_s10 = smov (!%p375_p3), 16   ;;  %vm1247_vm8 = vcmask (!%p375_p3), 261120   ;;  %vm1311_vm9 = vcmask (!%p375_p3), 293888  }
   0x9   : > { %s1856_s11 = smov (!%p375_p3), 20   ;;  %s1857_s15 = smov (!%p375_p3), 24  }
   0xe   : > { %s2228_s27 = smov (!%p468_p4, %s1842_s27), 1 }
   0xf   : > { %s1923_s9 = sshll.u32 %s2228_s27, 6 }
  0x10   : > { %s1929_s12 = scalar_lea.vmem %s2215_s1, %s1923_s9  ;;  %s1938_s16 = scalar_lea.vmem %s2214_s0, %s1923_s9 }
  0x11   : > { %v1761_v0 = vld [vmem:[%s1929_s12 + $0x20] ss:$0 sps:$4 sm:$0xff]   ;;  %v1763_v2 = vld [vmem:[%s1929_s12 + $0x28] ss:$0 sps:$4 sm:$0xff]   ;;  %v1765_v4 = vld [vmem:[%s1929_s12 + $0x18] ss:$0 sps:$4 sm:$0xff]   ;;  %s1997_s20 = scalar_lea.vmem %s2217_s3, %s1923_s9  ;;  %s2003_s23 = scalar_lea.vmem %s2216_s2, %s1923_s9 }
  0x12   : > { %v1762_v1 = vld [vmem:[%s1929_s12] ss:$0 sps:$4 sm:$0xff]   ;;  %648 = vrot.lane.b32.xlu1 %v1761_v0, %s1852_s13  ;;  %v1764_v3 = vld [vmem:[%s1929_s12 + $0x8] ss:$0 sps:$4 sm:$0xff]   ;;  %v1766_v5 = vld [vmem:[%s1929_s12 + $0x10] ss:$0 sps:$4 sm:$0xff]   ;;  %s2013_s27 = scalar_lea.vmem %s2219_s5, %s1923_s9  ;;  %s2047_s14 = scalar_lea.vmem %s2218_s4, %s1923_s9 }
  0x13   : > { %640 = vrot.lane.b32.xlu0 %v1762_v1, %s1852_s13  ;;  %v1946_v6 = vld [vmem:[%s1938_s16 + $0x8] sm:$0xf]  ;;  %v561_v7 = vld [vmem:[%s1938_s16 + $0xc] sm:$0x1]  ;;  %v1952_v9 = vld [vmem:[%s1938_s16] sm:$0xf] }
  0x14   : > { %v1624_v8 = vcombine.low %v1946_v6, %v561_v7  ;;  %v560_v10 = vld [vmem:[%s1938_s16 + $0x4] sm:$0x1]  ;;  %v1956_v11 = vld [vmem:[%s1938_s16 + $0x28] sm:$0xf]  ;;  %v565_v13 = vld [vmem:[%s1938_s16 + $0x2c] sm:$0x1] }
  0x15   : > { %v1623_v12 = vcombine.low %v1952_v9, %v560_v10  ;;  %v1962_v14 = vld [vmem:[%s1938_s16 + $0x20] sm:$0xf]  ;;  %v564_v15 = vld [vmem:[%s1938_s16 + $0x24] sm:$0x1]  ;;  %v1767_v16 = vld [vmem:[%s1929_s12 + $0x38] ss:$0 sps:$4 sm:$0xff]   ;;  %v1628_v18 = vcombine.low %v1956_v11, %v565_v13 }
  0x16   : > { %650 = vrot.lane.b32.xlu1 %v1763_v2, %s1852_s13  ;;  %v706_v17 = vshll.u32 %v1624_v8, 16  ;;  %v1627_v19 = vcombine.low %v1962_v14, %v564_v15  ;;  %v1969_v20 = vld [vmem:[%s1938_s16 + $0x18] sm:$0xf]  ;;  %v563_v21 = vld [vmem:[%s1938_s16 + $0x1c] sm:$0x1]  ;;  %v704_v22 = vshrl.u32 %v1624_v8, 16 }
  0x17   : > { %642 = vrot.lane.b32.xlu0 %v1764_v3, %s1852_s13  ;;  %v699_v23 = vshll.u32 %v1623_v12, 16  ;;  %v1973_v24 = vld [vmem:[%s1938_s16 + $0x10] sm:$0xf]  ;;  %v562_v25 = vld [vmem:[%s1938_s16 + $0x14] sm:$0x1]  ;;  %v697_v28 = vshrl.u32 %v1623_v12, 16  ;;  %v1626_v30 = vcombine.low %v1969_v20, %v563_v21 }
  0x18   : > { %v1768_v26 = vld [vmem:[%s1929_s12 + $0x30] ss:$0 sps:$4 sm:$0xff]   ;;  %v708_v27 = vrot.slane %v706_v17, 1  ;;  %v734_v29 = vshll.u32 %v1628_v18, 16  ;;  %v727_v32 = vshll.u32 %v1627_v19, 16  ;;  %v1625_v35 = vcombine.low %v1973_v24, %v562_v25 }
  0x19   : > { %v701_v31 = vrot.slane %v699_v23, 1  ;;  %v1981_v33 = vld [vmem:[%s1938_s16 + $0x38] sm:$0xf]  ;;  %v567_v34 = vld [vmem:[%s1938_s16 + $0x3c] sm:$0x1]  ;;  %v732_v38 = vshrl.u32 %v1628_v18, 16 }
  0x1a   : > { %646 = vrot.lane.b32.xlu1 %v1765_v4, %s1852_s13  ;;  %v1986_v36 = vld [vmem:[%s1938_s16 + $0x30] sm:$0xf]  ;;  %v566_v37 = vld [vmem:[%s1938_s16 + $0x34] sm:$0x1]  ;;  %v725_v39 = vshrl.u32 %v1627_v19, 16  ;;  %v709_v40 = vor.u32 %v708_v27, %v704_v22  ;;  %v736_v41 = vrot.slane %v734_v29, 1  ;;  %v1630_v43 = vcombine.low %v1981_v33, %v567_v34 }
  0x1b   : > { %644 = vrot.lane.b32.xlu0 %v1766_v5, %s1852_s13  ;;  %v720_v42 = vshll.u32 %v1626_v30, 16  ;;  %v702_v44 = vor.u32 %v701_v31, %v697_v28  ;;  %v729_v45 = vrot.slane %v727_v32, 1  ;;  %v713_v46 = vshll.u32 %v1625_v35, 16  ;;  %v569_v0 = vld [vmem:[%s2003_s23 + $0x8] sm:$0xf]  ;;  %s1858_s16 = smov 28  }
  0x1c   : > { %v1629_v47 = vcombine.low %v1986_v36, %v566_v37  ;;  %v737_v48 = vor.u32 %v736_v41, %v732_v38  ;;  %v718_v49 = vshrl.u32 %v1626_v30, 16  ;;  %v748_v51 = vshll.u32 %v1630_v43, 16  ;;  %v568_v1 = vld [vmem:[%s2003_s23] sm:$0xf]  ;;  %v573_v4 = vld [vmem:[%s2003_s23 + $0x28] sm:$0xf] }
  0x1d   : > { %v722_v50 = vrot.slane %v720_v42, 1  ;;  %v730_v52 = vor.u32 %v729_v45, %v725_v39  ;;  %v711_v53 = vshrl.u32 %v1625_v35, 16  ;;  %v715_v54 = vrot.slane %v713_v46, 1  ;;  %v572_v5 = vld [vmem:[%s2003_s23 + $0x20] sm:$0xf] }
  0x1e   : > { %654 = vrot.lane.b32.xlu1 %v1767_v16, %s1852_s13  ;;  %v741_v55 = vshll.u32 %v1629_v47, 16  ;;  %v746_v57 = vshrl.u32 %v1630_v43, 16  ;;  %v750_v58 = vrot.slane %v748_v51, 1  ;;  %v739_v60 = vshrl.u32 %v1629_v47, 16  ;;  %v571_v10 = vld [vmem:[%s2003_s23 + $0x18] sm:$0xf] }
  0x1f   : > { %652 = vrot.lane.b32.xlu0 %v1768_v26, %s1852_s13  ;;  %v723_v56 = vor.u32 %v722_v50, %v718_v49  ;;  %v716_v59 = vor.u32 %v715_v54, %v711_v53  ;;  %v1632_v2 = vcombine.low %v569_v0, %v569_v0  ;;  %v1631_v3 = vcombine.low %v568_v1, %v568_v1  ;;  %v570_v12 = vld [vmem:[%s2003_s23 + $0x10] sm:$0xf]  ;;  %v575_v16 = vld [vmem:[%s2003_s23 + $0x38] sm:$0xf]  ;;  %v1793_v21 = vld [vmem:[%s1997_s20 + $0x8] ss:$0 sps:$4 sm:$0xff]  }
  0x20   : > { %v743_v61 = vrot.slane %v741_v55, 1  ;;  %v751_v62 = vor.u32 %v750_v58, %v746_v57  ;;  %v1636_v7 = vcombine.low %v573_v4, %v573_v4  ;;  %v1635_v8 = vcombine.low %v572_v5, %v572_v5  ;;  %v574_v17 = vld [vmem:[%s2003_s23 + $0x30] sm:$0xf]  ;;  %v585_v22 = vld [vmem:[%s2003_s23 + $0xc] sm:$0x1] }
  0x21   : > { %v1634_v13 = vcombine.low %v571_v10, %v571_v10  ;;  %v1633_v15 = vcombine.low %v570_v12, %v570_v12  ;;  %v1638_v18 = vcombine.low %v575_v16, %v575_v16  ;;  %v1637_v19 = vcombine.low %v574_v17, %v574_v17  ;;  %v1794_v23 = vld [vmem:[%s1997_s20] ss:$0 sps:$4 sm:$0xff]   ;;  %v584_v25 = vld [vmem:[%s2003_s23 + $0x4] sm:$0x1]  ;;  %v1795_v27 = vld [vmem:[%s1997_s20 + $0x28] ss:$0 sps:$4 sm:$0xff]  }
  0x22   : > { %754 = vrot.lane.b32.xlu1 %v709_v40, %s1853_s17  ;;  %v744_v63 = vor.u32 %v743_v61, %v739_v60  ;;  %v1648_v26 = vcombine.low %v569_v0, %v585_v22  ;;  %v1647_v28 = vcombine.low %v568_v1, %v584_v25  ;;  %v589_v29 = vld [vmem:[%s2003_s23 + $0x2c] sm:$0x1]  ;;  %v1796_v30 = vld [vmem:[%s1997_s20 + $0x20] ss:$0 sps:$4 sm:$0xff]   ;;  %v588_v31 = vld [vmem:[%s2003_s23 + $0x24] sm:$0x1] }
  0x23   : > { %752 = vrot.lane.b32.xlu0 %v702_v44, %s1853_s17  ;;  %v1652_v32 = vcombine.low %v573_v4, %v589_v29  ;;  %v1797_v34 = vld [vmem:[%s1997_s20 + $0x18] ss:$0 sps:$4 sm:$0xff]   ;;  %v1651_v37 = vcombine.low %v572_v5, %v588_v31  ;;  %v587_v38 = vld [vmem:[%s2003_s23 + $0x1c] sm:$0x1]  ;;  %v1798_v39 = vld [vmem:[%s1997_s20 + $0x10] ss:$0 sps:$4 sm:$0xff]  }
  0x24   : > { %v882_v35 = vshll.u32 %v1648_v26, 16  ;;  %v875_v40 = vshll.u32 %v1647_v28, 16  ;;  %v586_v41 = vld [vmem:[%s2003_s23 + $0x14] sm:$0x1]  ;;  %v591_v42 = vld [vmem:[%s2003_s23 + $0x3c] sm:$0x1]  ;;  %v1650_v44 = vcombine.low %v571_v10, %v587_v38 }
  0x25   : > { %v590_v43 = vld [vmem:[%s2003_s23 + $0x34] sm:$0x1]  ;;  %v1799_v45 = vld [vmem:[%s1997_s20 + $0x38] ss:$0 sps:$4 sm:$0xff]   ;;  %v880_v46 = vshrl.u32 %v1648_v26, 16  ;;  %v1649_v49 = vcombine.low %v570_v12, %v586_v41  ;;  %v873_v51 = vshrl.u32 %v1647_v28, 16  ;;  %v1654_v54 = vcombine.low %v575_v16, %v591_v42 }
  0x26   : > { %762 = vrot.lane.b32.xlu1 %v737_v48, %s1853_s17  ;;  %v884_v47 = vrot.slane %v882_v35, 1  ;;  %v910_v48 = vshll.u32 %v1652_v32, 16  ;;  %v1800_v50 = vld [vmem:[%s1997_s20 + $0x30] ss:$0 sps:$4 sm:$0xff]   ;;  %v903_v53 = vshll.u32 %v1651_v37, 16  ;;  %v1653_v55 = vcombine.low %v574_v17, %v590_v43  ;;  %s1859_s23 = smov 32  }
  0x27   : > { %760 = vrot.lane.b32.xlu0 %v730_v52, %s1853_s17  ;;  %v877_v52 = vrot.slane %v875_v40, 1  ;;  %v908_v57 = vshrl.u32 %v1652_v32, 16  ;;  %v901_v61 = vshrl.u32 %v1651_v37, 16  ;;  %v894_v1 = vshrl.u32 %v1650_v44, 16  ;;  %v592_v22 = vld [vmem:[%s2047_s14] sm:$0xf] }
  0x28   : > { %v912_v58 = vrot.slane %v910_v48, 1  ;;  %v887_v5 = vshrl.u32 %v1649_v49, 16  ;;  %v922_v12 = vshrl.u32 %v1654_v54, 16  ;;  %v915_v16 = vshrl.u32 %v1653_v55, 16  ;;  %v597_v26 = vld [vmem:[%s2047_s14 + $0x28] sm:$0xf] }
  0x29   : > { %v878_v60 = vor.u32 %v877_v52, %v873_v51  ;;  %v1655_v25 = vcombine.low %v592_v22, %v592_v22  ;;  %v1660_v28 = vcombine.low %v597_v26, %v597_v26  ;;  %v594_v31 = vld [vmem:[%s2047_s14 + $0x10] sm:$0xf]  ;;  %v599_v35 = vld [vmem:[%s2047_s14 + $0x38] sm:$0xf]  ;;  %v1817_v40 = vld [vmem:[%s2013_s27 + $0x8] ss:$0 sps:$4 sm:$0xff]  }
  0x2a   : > { %758 = vrot.lane.b32.xlu1 %v723_v56, %s1853_s17  ;;  %v885_v56 = vor.u32 %v884_v47, %v880_v46  ;;  %v913_v0 = vor.u32 %v912_v58, %v908_v57  ;;  %v598_v37 = vld [vmem:[%s2047_s14 + $0x30] sm:$0xf]  ;;  %v1662_v38 = vcombine.low %v599_v35, %v599_v35  ;;  %v609_v41 = vld [vmem:[%s2047_s14 + $0xc] sm:$0x1]  ;;  %v1818_v42 = vld [vmem:[%s2013_s27] ss:$0 sps:$4 sm:$0xff]  }
  0x2b   : > { %756 = vrot.lane.b32.xlu0 %v716_v59, %s1853_s17  ;;  %v896_v59 = vshll.u32 %v1650_v44, 16  ;;  %v608_v43 = vld [vmem:[%s2047_s14 + $0x4] sm:$0x1]  ;;  %v613_v48 = vld [vmem:[%s2047_s14 + $0x2c] sm:$0x1] }
  0x2c   : > { %v1825_v46 = vld [vmem:[%s2220_s6] sm:$0xff]   ;;  %v1671_v47 = vcombine.low %v592_v22, %v608_v43  ;;  %v1676_v51 = vcombine.low %v597_v26, %v613_v48  ;;  %v1821_v52 = vld [vmem:[%s2013_s27 + $0x18] ss:$0 sps:$4 sm:$0xff]   ;;  %v1822_v57 = vld [vmem:[%s2013_s27 + $0x10] ss:$0 sps:$4 sm:$0xff]  }
  0x2d   : > { %1707 = vmatprep.subr.bf16.mxu0 %v1825_v46  ;;  %1721 = vmatprep.subr.bf16.mxu1 %v1825_v46 }
  0x2e   : > { %766 = vrot.lane.b32.xlu1 %v751_v62, %s1853_s17  ;;  %v905_v62 = vrot.slane %v903_v53, 1  ;;  %1708 = vmatpush3.bf16.msra.mxu0 %v1825_v46  ;;  %v1051_v58 = vshll.u32 %v1671_v47, 16 }
  0x2f   : > { %764 = vrot.lane.b32.xlu0 %v744_v63, %s1853_s17  ;;  %v889_v63 = vshll.u32 %v1649_v49, 16  ;;  %v1820_v49 = vld [vmem:[%s2013_s27 + $0x20] ss:$0 sps:$4 sm:$0xff]   ;;  %1724 = vmatpush3.bf16.msra.mxu1 %v1825_v46 }
  0x30   : > { %v906_v4 = vor.u32 %v905_v62, %v901_v61  ;;  %v614_v61 = vld [vmem:[%s2047_s14 + $0x34] sm:$0x1]  ;;  %v1823_v62 = vld [vmem:[%s2013_s27 + $0x38] ss:$0 sps:$4 sm:$0xff]  }
  0x32   : > { %794 = vrot.lane.b32.xlu1 %v1632_v2, %s1854_s24  ;;  %v898_v2 = vrot.slane %v896_v59, 1  ;;  %v610_v59 = vld [vmem:[%s2047_s14 + $0x14] sm:$0x1] }
  0x33   : > { %792 = vrot.lane.b32.xlu0 %v1631_v3, %s1854_s24  ;;  %v924_v3 = vshll.u32 %v1654_v54, 16  ;;  %v1826_v54 = vld [vmem:[%s2220_s6 + $0x8] sm:$0xff]  }
  0x34   : > { %v899_v10 = vor.u32 %v898_v2, %v894_v1  ;;  %1709 = vmatprep.subr.bf16.mxu0 %v1826_v54  ;;  %1722 = vmatprep.subr.bf16.mxu1 %v1826_v54  ;;  %v1086_v2 = vshll.u32 %v1676_v51, 16 }
  0x35   : > { %1710 = vmatpush3.bf16.msra.mxu0 %v1826_v54  ;;  %1725 = vmatpush3.bf16.msra.mxu1 %v1826_v54 }
  0x36   : > { %802 = vrot.lane.b32.xlu1 %v1636_v7, %s1854_s24  ;;  %v891_v7 = vrot.slane %v889_v63, 1 }
  0x37   : > { %800 = vrot.lane.b32.xlu0 %v1635_v8, %s1854_s24  ;;  %v917_v8 = vshll.u32 %v1653_v55, 16 }
  0x39   : > { %v919_v17 = vrot.slane %v917_v8, 1  ;;  %v1053_v8 = vrot.slane %v1051_v58, 1 }
  0x3a   : > { %798 = vrot.lane.b32.xlu1 %v1634_v13, %s1854_s24  ;;  %v926_v13 = vrot.slane %v924_v3, 1  ;;  %v1827_v3 = vld [vmem:[%s2220_s6 + $0x10] ss:$0 sps:$4 sm:$0x33]  }
  0x3b   : > { %796 = vrot.lane.b32.xlu0 %v1633_v15, %s1854_s24  ;;  %v892_v15 = vor.u32 %v891_v7, %v887_v5  ;;  %v1824_v5 = vld [vmem:[%s2013_s27 + $0x30] ss:$0 sps:$4 sm:$0xff]   ;;  %v1049_v7 = vshrl.u32 %v1671_v47, 16  ;;  %1727 = vmatprep.subr.msk.bf16.mxu0 %vm1324_vm0, %v1827_v3 }
  0x3c   : > { %1728 = vmatprep.subr.msk.bf16.mxu1 %vm1324_vm0, %v1827_v3 }
  0x3e   : > { %806 = vrot.lane.b32.xlu1 %v1638_v18, %s1854_s24  ;;  %v927_v18 = vor.u32 %v926_v13, %v922_v12  ;;  %v1677_v13 = vcombine.low %v598_v37, %v614_v61 }
  0x3f   : > { %804 = vrot.lane.b32.xlu0 %v1637_v19, %s1854_s24  ;;  %v920_v19 = vor.u32 %v919_v17, %v915_v16  ;;  %v1084_v17 = vshrl.u32 %v1676_v51, 16 }
  0x42   : > { %834 = vrot.lane.b32.xlu1 %v1793_v21, %s1855_s10  ;;  %v593_v21 = vld [vmem:[%s2047_s14 + $0x8] sm:$0xf] }
  0x43   : > { %832 = vrot.lane.b32.xlu0 %v1794_v23, %s1855_s10  ;;  %v1656_v23 = vcombine.low %v593_v21, %v593_v21  ;;  %v1672_v44 = vcombine.low %v593_v21, %v609_v41  ;;  %v1054_v21 = vor.u32 %v1053_v8, %v1049_v7 }
  0x45   : > { %v1058_v53 = vshll.u32 %v1672_v44, 16  ;;  %v1056_v63 = vshrl.u32 %v1672_v44, 16 }
  0x46   : > { %842 = vrot.lane.b32.xlu1 %v1795_v27, %s1855_s10  ;;  %v596_v27 = vld [vmem:[%s2047_s14 + $0x20] sm:$0xf] }
  0x47   : > { %840 = vrot.lane.b32.xlu0 %v1796_v30, %s1855_s10  ;;  %v1659_v29 = vcombine.low %v596_v27, %v596_v27  ;;  %v595_v30 = vld [vmem:[%s2047_s14 + $0x18] sm:$0xf]  ;;  %v1060_v1 = vrot.slane %v1058_v53, 1 }
  0x48   : > { %v1658_v32 = vcombine.low %v595_v30, %v595_v30 }
  0x49   : > { %v1061_v16 = vor.u32 %v1060_v1, %v1056_v63 }
  0x4a   : > { %838 = vrot.lane.b32.xlu1 %v1797_v34, %s1855_s10  ;;  %v1657_v34 = vcombine.low %v594_v31, %v594_v31 }
  0x4b   : > { %836 = vrot.lane.b32.xlu0 %v1798_v39, %s1855_s10  ;;  %v1661_v39 = vcombine.low %v598_v37, %v598_v37 }
  0x4e   : > { %846 = vrot.lane.b32.xlu1 %v1799_v45, %s1855_s10  ;;  %v1819_v45 = vld [vmem:[%s2013_s27 + $0x28] ss:$0 sps:$4 sm:$0xff]  }
  0x4f   : > { %844 = vrot.lane.b32.xlu0 %v1800_v50, %s1855_s10  ;;  %v612_v50 = vld [vmem:[%s2047_s14 + $0x24] sm:$0x1]  ;;  %s541_s10 = scalar_lea.vmem %s2222_s8, %s1923_s9 }
  0x50   : > { %v1675_v55 = vcombine.low %v596_v27, %v612_v50 }
  0x52   : > { %930 = vrot.lane.b32.xlu1 %v885_v56, %s1856_s11  ;;  %v611_v56 = vld [vmem:[%s2047_s14 + $0x1c] sm:$0x1]  ;;  %v1077_v22 = vshrl.u32 %v1675_v55, 16 }
  0x53   : > { %928 = vrot.lane.b32.xlu0 %v878_v60, %s1856_s11  ;;  %v615_v60 = vld [vmem:[%s2047_s14 + $0x3c] sm:$0x1] }
  0x54   : > { %v1678_v12 = vcombine.low %v599_v35, %v615_v60 }
  0x56   : > { %938 = vrot.lane.b32.xlu1 %v913_v0, %s1856_s11  ;;  %v1674_v0 = vcombine.low %v595_v30, %v611_v56 }
  0x57   : > { %936 = vrot.lane.b32.xlu0 %v906_v4, %s1856_s11  ;;  %v1673_v4 = vcombine.low %v594_v31, %v610_v59 }
  0x58   : > { %v1070_v27 = vshrl.u32 %v1674_v0, 16 }
  0x59   : > { %v1063_v31 = vshrl.u32 %v1673_v4, 16 }
  0x5a   : > { %934 = vrot.lane.b32.xlu1 %v899_v10, %s1856_s11  ;;  %v1079_v10 = vshll.u32 %v1675_v55, 16 }
  0x5b   : > { %932 = vrot.lane.b32.xlu0 %v892_v15, %s1856_s11  ;;  %v1326_v15 = vsel %vm1324_vm0, %v1827_v3, 0 }
  0x5c   : > { %1712 = vmatpush3.bf16.msra.mxu0 %v1326_v15  ;;  %1726 = vmatpush3.bf16.msra.mxu1 %v1326_v15 }
  0x5e   : > { %942 = vrot.lane.b32.xlu1 %v927_v18, %s1856_s11  ;;  %v1088_v18 = vrot.slane %v1086_v2, 1 }
  0x5f   : > { %940 = vrot.lane.b32.xlu0 %v920_v19, %s1856_s11  ;;  %v1072_v19 = vshll.u32 %v1674_v0, 16 }
  0x60   : > { %v1089_v26 = vor.u32 %v1088_v18, %v1084_v17 }
  0x62   : > { %970 = vrot.lane.b32.xlu1 %v1656_v23, %s1857_s15  ;;  %v1081_v23 = vrot.slane %v1079_v10, 1 }
  0x63   : > { %968 = vrot.lane.b32.xlu0 %v1655_v25, %s1857_s15  ;;  %v1065_v25 = vshll.u32 %v1673_v4, 16 }
  0x64   : > { %v1082_v30 = vor.u32 %v1081_v23, %v1077_v22 }
  0x66   : > { %978 = vrot.lane.b32.xlu1 %v1660_v28, %s1857_s15  ;;  %v1074_v28 = vrot.slane %v1072_v19, 1 }
  0x67   : > { %976 = vrot.lane.b32.xlu0 %v1659_v29, %s1857_s15  ;;  %v1100_v29 = vshll.u32 %v1678_v12, 16 }
  0x6a   : > { %974 = vrot.lane.b32.xlu1 %v1658_v32, %s1857_s15  ;;  %v1067_v32 = vrot.slane %v1065_v25, 1 }
  0x6b   : > { %972 = vrot.lane.b32.xlu0 %v1657_v34, %s1857_s15  ;;  %v1093_v34 = vshll.u32 %v1677_v13, 16 }
  0x6c   : > { %v1068_v41 = vor.u32 %v1067_v32, %v1063_v31 }
  0x6d   : > { %v1095_v43 = vrot.slane %v1093_v34, 1 }
  0x6e   : > { %982 = vrot.lane.b32.xlu1 %v1662_v38, %s1857_s15  ;;  %v1075_v38 = vor.u32 %v1074_v28, %v1070_v27 }
  0x6f   : > { %980 = vrot.lane.b32.xlu0 %v1661_v39, %s1857_s15  ;;  %v1098_v39 = vshrl.u32 %v1678_v12, 16 }
  0x72   : > { %1010 = vrot.lane.b32.xlu1 %v1817_v40, %s1858_s16  ;;  %v1102_v40 = vrot.slane %v1100_v29, 1 }
  0x73   : > { %1008 = vrot.lane.b32.xlu0 %v1818_v42, %s1858_s16  ;;  %v1091_v42 = vshrl.u32 %v1677_v13, 16 }
  0x74   : > { %v1103_v46 = vor.u32 %v1102_v40, %v1098_v39 }
  0x75   : > { %v1096_v47 = vor.u32 %v1095_v43, %v1091_v42 }
  0x76   : > { %1018 = vrot.lane.b32.xlu1 %v1819_v45, %s1858_s16 }
  0x77   : > { %1016 = vrot.lane.b32.xlu0 %v1820_v49, %s1858_s16 }
  0x7a   : > { %1014 = vrot.lane.b32.xlu1 %v1821_v52, %s1858_s16 }
  0x7b   : > { %1012 = vrot.lane.b32.xlu0 %v1822_v57, %s1858_s16 }
  0x7e   : > { %1022 = vrot.lane.b32.xlu1 %v1823_v62, %s1858_s16 }
  0x7f   : > { %1020 = vrot.lane.b32.xlu0 %v1824_v5, %s1858_s16 }
  0x82   : > { %1106 = vrot.lane.b32.xlu1 %v1061_v16, %s1859_s23 }
  0x83   : > { %1104 = vrot.lane.b32.xlu0 %v1054_v21, %s1859_s23 }
  0x84   : > { %v649_v35 = vpop.permute.xlu1 %648 }
  0x85   : > { %v641_v37 = vpop.permute.xlu0 %640  ;;  %v1135_v60 = vsel %vm1120_vm1, %v1962_v14, %v649_v35 }
  0x86   : > { %1114 = vrot.lane.b32.xlu1 %v1089_v26, %s1859_s23  ;;  %v1123_v54 = vsel %vm1120_vm1, %v1952_v9, %v641_v37 }
  0x87   : > { %1112 = vrot.lane.b32.xlu0 %v1082_v30, %s1859_s23 }
  0x88   : > { %v651_v44 = vpop.permute.xlu1 %650 }
  0x89   : > { %v643_v45 = vpop.permute.xlu0 %642  ;;  %v1138_v58 = vsel %vm1120_vm1, %v1956_v11, %v651_v44 }
  0x8a   : > { %1110 = vrot.lane.b32.xlu1 %v1075_v38, %s1859_s23  ;;  %v1126_v52 = vsel %vm1120_vm1, %v1946_v6, %v643_v45 }
  0x8b   : > { %1108 = vrot.lane.b32.xlu0 %v1068_v41, %s1859_s23 }
  0x8c   : > { %v647_v48 = vpop.permute.xlu1 %646 }
  0x8d   : > { %v645_v49 = vpop.permute.xlu0 %644  ;;  %v1132_v9 = vsel %vm1120_vm1, %v1969_v20, %v647_v48 }
  0x8e   : > { %1118 = vrot.lane.b32.xlu1 %v1103_v46, %s1859_s23  ;;  %v1129_v0 = vsel %vm1120_vm1, %v1973_v24, %v645_v49 }
  0x8f   : > { %1116 = vrot.lane.b32.xlu0 %v1096_v47, %s1859_s23 }
  0x90   : > { %v655_v50 = vpop.permute.xlu1 %654 }
  0x91   : > { %v653_v51 = vpop.permute.xlu0 %652  ;;  %v1144_v14 = vsel %vm1120_vm1, %v1981_v33, %v655_v50 }
  0x92   : > { %v1141_v4 = vsel %vm1120_vm1, %v1986_v36, %v653_v51 }
  0x94   : > { %v755_v53 = vpop.permute.xlu1 %754 }
  0x95   : > { %v1149_v55 = vsel %vm1145_vm2, %v1126_v52, %v755_v53  ;;  %v753_v56 = vpop.permute.xlu0 %752 }
  0x96   : > { %v1147_v57 = vsel %vm1145_vm2, %v1123_v54, %v753_v56 }
  0x98   : > { %v763_v59 = vpop.permute.xlu1 %762 }
  0x99   : > { %v1157_v61 = vsel %vm1145_vm2, %v1138_v58, %v763_v59  ;;  %v761_v62 = vpop.permute.xlu0 %760 }
  0x9a   : > { %v1155_v6 = vsel %vm1145_vm2, %v1135_v60, %v761_v62 }
  0x9c   : > { %v759_v63 = vpop.permute.xlu1 %758 }
  0x9d   : > { %v1153_v1 = vsel %vm1145_vm2, %v1132_v9, %v759_v63  ;;  %v757_v2 = vpop.permute.xlu0 %756 }
  0x9e   : > { %v1151_v11 = vsel %vm1145_vm2, %v1129_v0, %v757_v2 }
  0xa0   : > { %v767_v3 = vpop.permute.xlu1 %766 }
  0xa1   : > { %v1161_v5 = vsel %vm1145_vm2, %v1144_v14, %v767_v3  ;;  %v765_v7 = vpop.permute.xlu0 %764 }
  0xa2   : > { %v1159_v20 = vsel %vm1145_vm2, %v1141_v4, %v765_v7 }
  0xa4   : > { %v795_v8 = vpop.permute.xlu1 %794 }
  0xa5   : > { %v1166_v24 = vsel %vm1162_vm3, %v1149_v55, %v795_v8  ;;  %v793_v10 = vpop.permute.xlu0 %792 }
  0xa6   : > { %v1164_v12 = vsel %vm1162_vm3, %v1147_v57, %v793_v10 }
  0xa8   : > { %v803_v13 = vpop.permute.xlu1 %802 }
  0xa9   : > { %v1174_v15 = vsel %vm1162_vm3, %v1157_v61, %v803_v13  ;;  %v801_v33 = vpop.permute.xlu0 %800 }
  0xaa   : > { %v1172_v16 = vsel %vm1162_vm3, %v1155_v6, %v801_v33 }
  0xac   : > { %v799_v17 = vpop.permute.xlu1 %798 }
  0xad   : > { %v2119_v36 = vsel %vm1162_vm3, %v1153_v1, %v799_v17  ;;  %v797_v18 = vpop.permute.xlu0 %796 }
  0xae   : > { %v2122_v19 = vsel %vm1162_vm3, %v1151_v11, %v797_v18 }
  0xb0   : > { %v807_v21 = vpop.permute.xlu1 %806 }
  0xb1   : > { %v2125_v22 = vsel %vm1162_vm3, %v1161_v5, %v807_v21  ;;  %v805_v23 = vpop.permute.xlu0 %804 }
  0xb2   : > { %v2128_v25 = vsel %vm1162_vm3, %v1159_v20, %v805_v23 }
  0xb4   : > { %v835_v26 = vpop.permute.xlu1 %834 }
  0xb5   : > { %v833_v27 = vpop.permute.xlu0 %832  ;;  %v1183_v59 = vsel %vm1179_vm4, %v1166_v24, %v835_v26 }
  0xb6   : > { %v1181_v61 = vsel %vm1179_vm4, %v1164_v12, %v833_v27 }
  0xb8   : > { %v843_v28 = vpop.permute.xlu1 %842 }
  0xb9   : > { %v841_v29 = vpop.permute.xlu0 %840  ;;  %v1191_v2 = vsel %vm1179_vm4, %v1174_v15, %v843_v28 }
  0xba   : > { %v1189_v4 = vsel %vm1179_vm4, %v1172_v16, %v841_v29 }
  0xbc   : > { %v839_v30 = vpop.permute.xlu1 %838 }
  0xbd   : > { %v837_v31 = vpop.permute.xlu0 %836  ;;  %v1187_v15 = vsel %vm1179_vm4, %v2119_v36, %v839_v30 }
  0xbe   : > { %v1185_v18 = vsel %vm1179_vm4, %v2122_v19, %v837_v31 }
  0xc0   : > { %v2130_v32 = vpop.permute.xlu1 %846 }
  0xc1   : > { %v2132_v34 = vpop.permute.xlu0 %844 }
  0xc4   : > { %v931_v35 = vpop.permute.xlu1 %930 }
  0xc5   : > { %v929_v37 = vpop.permute.xlu0 %928  ;;  %v1200_v62 = vsel %vm1196_vm5, %v1183_v59, %v931_v35  ;;  %v1195_v35 = vsel %vm1179_vm4, %v2125_v22, %v2130_v32 }
  0xc6   : > { %v1198_v6 = vsel %vm1196_vm5, %v1181_v61, %v929_v37 }
  0xc8   : > { %v939_v38 = vpop.permute.xlu1 %938 }
  0xc9   : > { %v937_v39 = vpop.permute.xlu0 %936  ;;  %v1208_v5 = vsel %vm1196_vm5, %v1191_v2, %v939_v38  ;;  %v1193_v38 = vsel %vm1179_vm4, %v2128_v25, %v2132_v34 }
  0xca   : > { %v1206_v20 = vsel %vm1196_vm5, %v1189_v4, %v937_v39 }
  0xcc   : > { %v935_v40 = vpop.permute.xlu1 %934 }
  0xcd   : > { %v933_v41 = vpop.permute.xlu0 %932  ;;  %v1204_v21 = vsel %vm1196_vm5, %v1187_v15, %v935_v40 }
  0xce   : > { %v1202_v26 = vsel %vm1196_vm5, %v1185_v18, %v933_v41 }
  0xd0   : > { %v2134_v42 = vpop.permute.xlu1 %942 }
  0xd1   : > { %v2136_v43 = vpop.permute.xlu0 %940  ;;  %v1212_v39 = vsel %vm1196_vm5, %v1195_v35, %v2134_v42 }
  0xd2   : > { %v1210_v22 = vsel %vm1196_vm5, %v1193_v38, %v2136_v43  ;;  %v1679_v43 = vld [vmem:[%s2221_s7] ss:$0 sm:$0xff] }
  0xd4   : > { %v971_v44 = vpop.permute.xlu1 %970 }
  0xd5   : > { %v969_v45 = vpop.permute.xlu0 %968  ;;  %v1217_v9 = vsel %vm1213_vm6, %v1200_v62, %v971_v44 }
  0xd6   : > { %v1215_v63 = vsel %vm1213_vm6, %v1198_v6, %v969_v45 }
  0xd8   : > { %v979_v46 = vpop.permute.xlu1 %978 }
  0xd9   : > { %v977_v47 = vpop.permute.xlu0 %976  ;;  %v1225_v8 = vsel %vm1213_vm6, %v1208_v5, %v979_v46 }
  0xda   : > { %v1223_v10 = vsel %vm1213_vm6, %v1206_v20, %v977_v47 }
  0xdc   : > { %v975_v48 = vpop.permute.xlu1 %974 }
  0xdd   : > { %v973_v49 = vpop.permute.xlu0 %972  ;;  %v1221_v27 = vsel %vm1213_vm6, %v1204_v21, %v975_v48 }
  0xde   : > { %v1219_v36 = vsel %vm1213_vm6, %v1202_v26, %v973_v49 }
  0xe0   : > { %v983_v50 = vpop.permute.xlu1 %982 }
  0xe1   : > { %v981_v51 = vpop.permute.xlu0 %980  ;;  %v1229_v32 = vsel %vm1213_vm6, %v1212_v39, %v983_v50 }
  0xe2   : > { %v1227_v44 = vsel %vm1213_vm6, %v1210_v22, %v981_v51 }
  0xe4   : > { %v1011_v52 = vpop.permute.xlu1 %1010 }
  0xe5   : > { %v1009_v53 = vpop.permute.xlu0 %1008  ;;  %v1234_v0 = vsel %vm1230_vm7, %v1217_v9, %v1011_v52 }
  0xe6   : > { %v1232_v11 = vsel %vm1230_vm7, %v1215_v63, %v1009_v53 }
  0xe8   : > { %v1019_v54 = vpop.permute.xlu1 %1018 }
  0xe9   : > { %v1017_v55 = vpop.permute.xlu0 %1016  ;;  %v1242_v12 = vsel %vm1230_vm7, %v1225_v8, %v1019_v54 }
  0xea   : > { %v1240_v33 = vsel %vm1230_vm7, %v1223_v10, %v1017_v55 }
  0xec   : > { %v1015_v56 = vpop.permute.xlu1 %1014 }
  0xed   : > { %v1013_v57 = vpop.permute.xlu0 %1012  ;;  %v1238_v29 = vsel %vm1230_vm7, %v1221_v27, %v1015_v56 }
  0xee   : > { %v1236_v19 = vsel %vm1230_vm7, %v1219_v36, %v1013_v57 }
  0xf0   : > { %v1023_v58 = vpop.permute.xlu1 %1022 }
  0xf1   : > { %v1021_v60 = vpop.permute.xlu0 %1020  ;;  %v1246_v45 = vsel %vm1230_vm7, %v1229_v32, %v1023_v58 }
  0xf2   : > { %v1244_v47 = vsel %vm1230_vm7, %v1227_v44, %v1021_v60 }
  0xf4   : > { %v1107_v1 = vpop.permute.xlu1 %1106 }
  0xf5   : > { %v1251_v14 = vsel %vm1247_vm8, %v1234_v0, %v1107_v1  ;;  %v1105_v3 = vpop.permute.xlu0 %1104 }
  0xf6   : > { %v1249_v7 = vsel %vm1247_vm8, %v1232_v11, %v1105_v3 }
  0xf7   : > { %v1680_v24 = vcombine.low %v1249_v7, %v1251_v14 }
  0xf8   : > { %v1115_v13 = vpop.permute.xlu1 %1114 }
  0xf9   : > { %v1259_v16 = vsel %vm1247_vm8, %v1242_v12, %v1115_v13  ;;  %1713 = vmatprep.mubr.msk.bf16.mxu0 %vm1311_vm9, %v1680_v24  ;;  %v1113_v17 = vpop.permute.xlu0 %1112 }
  0xfa   : > { %v1257_v23 = vsel %vm1247_vm8, %v1240_v33, %v1113_v17 }
  0xfb   : > { %v1682_v28 = vcombine.low %v1257_v23, %v1259_v16 }
  0xfc   : > { %v1111_v30 = vpop.permute.xlu1 %1110 }
  0xfd   : > { %v1255_v31 = vsel %vm1247_vm8, %v1238_v29, %v1111_v30  ;;  %1717 = vmatprep.mubr.msk.bf16.mxu1 %vm1311_vm9, %v1682_v28  ;;  %v1109_v37 = vpop.permute.xlu0 %1108 }
  0xfe   : > { %v1253_v40 = vsel %vm1247_vm8, %v1236_v19, %v1109_v37 }
  0xff   : > { %v1681_v41 = vcombine.low %v1253_v40, %v1255_v31 }
 0x100   : > { %v1119_v46 = vpop.permute.xlu1 %1118 }
 0x101   : > { %v1263_v25 = vsel %vm1247_vm8, %v1246_v45, %v1119_v46  ;;  %1714 = vmatmul.mubr.msk.bf16.vlgmr.msra.gmra.mrb[0].mxu0 %vm1311_vm9, %v1681_v41  ;;  %v1117_v34 = vpop.permute.xlu0 %1116 }
 0x102   : > { %v1261_v42 = vsel %vm1247_vm8, %v1244_v47, %v1117_v34 }
 0x103   : > { %v1683_v48 = vcombine.low %v1261_v42, %v1263_v25 }
 0x105   : > { %1718 = vmatmul.mubr.msk.bf16.vlgmr.msra.gmra.mrb[0].mxu1 %vm1311_vm9, %v1683_v48 }
 0x1d4   : > { %v1715_v49 = vpop.f32.mrb[0].mxu0 }
 0x1d5   : > { %v1371_v50 = vadd.f32 %v1715_v49, %v1679_v43  ;;  %v1362_v51 = vpop.f32.mrb[1].mxu0 }
 0x1d6   : > { %v1363_v52 = vadd.f32 %v1679_v43, %v1362_v51  ;;  %v1716_v53 = vpop.f32.mrb[2].mxu0 }
 0x1d7   : > { %1395 = vst.msk [vmem:[%s541_s10 + $0x10] sm:$0xff] %vm1120_vm1, %v1371_v50  ;;  %v1374_v54 = vadd.f32 %v1716_v53, %v1679_v43  ;;  %v1365_v55 = vpop.f32.mrb[3].mxu0 }
 0x1d8   : > { %1393 = vst.msk [vmem:[%s541_s10] sm:$0xff] %vm1120_vm1, %v1363_v52  ;;  %v1366_v56 = vadd.f32 %v1679_v43, %v1365_v55  ;;  %v1719_v57 = vpop.f32.mrb[0].mxu1 }
 0x1d9   : > { %1396 = vst.msk [vmem:[%s541_s10 + $0x18] sm:$0xff] %vm1120_vm1, %v1374_v54  ;;  %v1387_v58 = vadd.f32 %v1719_v57, %v1679_v43  ;;  %v1378_v59 = vpop.f32.mrb[1].mxu1 }
 0x1da   : > { %1394 = vst.msk [vmem:[%s541_s10 + $0x8] sm:$0xff] %vm1120_vm1, %v1366_v56  ;;  %v1379_v60 = vadd.f32 %v1679_v43, %v1378_v59  ;;  %v1720_v61 = vpop.f32.mrb[2].mxu1 }
 0x1db   : > { %1399 = vst.msk [vmem:[%s541_s10 + $0x30] sm:$0xff] %vm1120_vm1, %v1387_v58  ;;  %v1390_v62 = vadd.f32 %v1720_v61, %v1679_v43  ;;  %v1381_v6 = vpop.f32.mrb[3].mxu1 }
 0x1dc   : > { %1397 = vst.msk [vmem:[%s541_s10 + $0x20] sm:$0xff] %vm1120_vm1, %v1379_v60  ;;  %v1382_v9 = vadd.f32 %v1679_v43, %v1381_v6 }
 0x1dd   : > { %1400 = vst.msk [vmem:[%s541_s10 + $0x38] sm:$0xff] %vm1120_vm1, %v1390_v62 }
 0x1de   : > { %1398 = vst.msk [vmem:[%s541_s10 + $0x28] sm:$0xff] %vm1120_vm1, %v1382_v9 }
 0x1df PF: > { %s18_s29 = sadd.s32 1, %s1850_s29   ;;  %s2223_s27 = smov %s1846_s28 }
 0x1e0   : > { %p15_p5 = scmp.ge.s32.totalorder %s18_s29, 4   ;;  %s2224_s28 = smov %s2226_s30 }
 0x1e2   :  { %17 = sbr.rel (!%p15_p5) target bundleno = 2 (0x2), region = 97 }

</bundles_post_ra>
